<compile_context>
chip_gen: v7x
topology: tpu7x:2x2x1
jax: 0.10.0
libtpu: 0.0.40
codegen_flags: <defaults>
</compile_context>

<pallas_src>
import jax
import jax.numpy as jnp
from jax.experimental import pallas as pl
from jax.experimental.pallas import tpu as pltpu

_LANE = 128
# Masks padded logit columns before softmax: padded w3 columns are zero, so the
# padded logits are exactly -1e30 in f32 and exp() underflows to 0.  This
# invariant requires b3 (padded) to stay f32 -- do NOT fold it into bf16.
_NEG_BIG = -1e30


def _round_up(n, m):
    return ((n + m - 1) // m) * m


def _cdiv(a, b):
    return -(-a // b)


def policy_kernel(x_ref, w1_ref, b1_ref, w2_ref, b2_ref, w3_ref, b3_ref, o_ref):
    # In-kernel bf16 cast of the activations (VPU) feeding the MXU.
    x = x_ref[...].astype(jnp.bfloat16)

    # Layer 1: bf16 matmul on the MXU, f32 accumulate; bias + ReLU in f32.
    h1 = jnp.dot(x, w1_ref[...], preferred_element_type=jnp.float32)
    h1 = jnp.maximum(h1 + b1_ref[...], 0.0)

    # Layer 2
    h2 = jnp.dot(h1.astype(jnp.bfloat16), w2_ref[...],
                 preferred_element_type=jnp.float32)
    h2 = jnp.maximum(h2 + b2_ref[...], 0.0)

    # Layer 3: columns padded to 128 lanes for the MXU; padded bias = -1e30.
    logits = jnp.dot(h2.astype(jnp.bfloat16), w3_ref[...],
                     preferred_element_type=jnp.float32)
    logits = logits + b3_ref[...]

    # Numerically stable softmax; padded columns contribute exp(-huge) == 0.
    m = jnp.max(logits, axis=-1, keepdims=True)
    e = jnp.exp(logits - m)
    denom = jnp.sum(e, axis=-1, keepdims=True)
    probs = e / denom  # exact normalization (rows sum to 1 to f32 precision)

    # Store only the real output columns (unpadded, lane-masked vst) -> 32x
    # less HBM write traffic than the padded f32 slab.
    out_dim = o_ref.shape[-1]
    o_ref[...] = probs[:, :out_dim].astype(o_ref.dtype)


def pack_params(w1, b1, w2, b2, w3, b3):
    """One-time parameter prep (call once, reuse across forward calls).

    Pads the last layer's columns to a lane-dense width for the MXU and
    pre-casts matmul operands to bf16.  Biases stay f32 for the VPU epilogue.
    """
    H = w1.shape[1]
    out_dim = w3.shape[1]
    op = _round_up(out_dim, _LANE)

    w3p = jnp.zeros((H, op), jnp.float32).at[:, :out_dim].set(w3)
    b3p = jnp.full((1, op), _NEG_BIG, jnp.float32).at[:, :out_dim].set(b3)

    return {
        "w1": w1.astype(jnp.bfloat16), "b1": b1.astype(jnp.float32),
        "w2": w2.astype(jnp.bfloat16), "b2": b2.astype(jnp.float32),
        "w3": w3p.astype(jnp.bfloat16), "b3": b3p,  # b3p must stay f32
        "out_dim": out_dim,
    }


def policy_forward(x, params, *, block_batch=2048):
    """x: (B, in_dim) f32; params from pack_params. Returns (B, out_dim) f32."""
    B, in_dim = x.shape
    out_dim = params["out_dim"]
    w1, b1 = params["w1"], params["b1"]
    w2, b2 = params["w2"], params["b2"]
    w3, b3 = params["w3"], params["b3"]

    # --- batch tiling --------------------------------------------------------
    # Tiles are multiples of 16 rows (bf16 sublane packing).  Force >=2 grid
    # steps when the batch allows so the "parallel" axis can shard across both
    # TensorCores on v7x; pick tb = ceil(bp16 / n_steps) to limit pad waste.
    bp16 = _round_up(B, 16)
    n_steps = max(_cdiv(bp16, block_batch), 2 if bp16 >= 32 else 1)
    tb = _round_up(_cdiv(bp16, n_steps), 16)
    bp = n_steps * tb

    # Only pad when needed; x stays f32 (cast to bf16 inside the kernel).
    xp = x if bp == B else jnp.pad(x, ((0, bp - B), (0, 0)))

    # Weights/biases: same block every step -> VMEM-resident across the grid.
    resident = lambda a: pl.BlockSpec(a.shape, lambda i: (0, 0))

    out = pl.pallas_call(
        policy_kernel,
        out_shape=jax.ShapeDtypeStruct((bp, out_dim), jnp.float32),
        grid_spec=pltpu.PrefetchScalarGridSpec(
            num_scalar_prefetch=0,
            grid=(n_steps,),
            in_specs=[
                pl.BlockSpec((tb, in_dim), lambda i: (i, 0)),  # x: batch-tiled
                resident(w1), resident(b1),
                resident(w2), resident(b2),
                resident(w3), resident(b3),
            ],
            # Unpadded output block: last dim == full array dim (masked vst),
            # so the HBM writeback is only out_dim columns wide.
            out_specs=pl.BlockSpec((tb, out_dim), lambda i: (i, 0)),
        ),
        compiler_params=pltpu.CompilerParams(
            dimension_semantics=("parallel",),
            vmem_limit_bytes=32 * 1024 * 1024,
        ),
    )(xp, w1, b1, w2, b2, w3, b3)

    return out if bp == B else out[:B]


def init_params(key, input_dim, hidden_dim, output_dim):
    """Deterministic synthetic parameters (Kaiming-uniform-ish scale)."""
    k1, k2, k3, k4, k5, k6 = jax.random.split(key, 6)

    def lin(kw, kb, fan_in, fan_out):
        bound = 1.0 / jnp.sqrt(float(fan_in))
        w = jax.random.uniform(kw, (fan_in, fan_out), jnp.float32, -bound, bound)
        b = jax.random.uniform(kb, (1, fan_out), jnp.float32, -bound, bound)
        return w, b

    w1, b1 = lin(k1, k2, input_dim, hidden_dim)
    w2, b2 = lin(k3, k4, hidden_dim, hidden_dim)
    w3, b3 = lin(k5, k6, hidden_dim, output_dim)
    return w1, b1, w2, b2, w3, b3


if __name__ == "__main__":
    key = jax.random.PRNGKey(0)
    kx, kp = jax.random.split(key)

    batch, input_dim, hidden_dim, output_dim = 8, 32, 128, 4

    x = jax.random.normal(kx, (batch, input_dim), jnp.float32)
    w1, b1, w2, b2, w3, b3 = init_params(kp, input_dim, hidden_dim, output_dim)

    params = pack_params(w1, b1, w2, b2, w3, b3)   # one-time prep
    out = policy_forward(x, params)
    out = jax.block_until_ready(out)

    # Reference in plain JAX mirroring the kernel's bf16 matmul / f32 epilogue.
    bf16 = jnp.bfloat16
    h1 = jnp.maximum(
        jnp.dot(x.astype(bf16), w1.astype(bf16),
                preferred_element_type=jnp.float32) + b1, 0.0)
    h2 = jnp.maximum(
        jnp.dot(h1.astype(bf16), w2.astype(bf16),
                preferred_element_type=jnp.float32) + b2, 0.0)
    logits = jnp.dot(h2.astype(bf16), w3.astype(bf16),
                     preferred_element_type=jnp.float32) + b3
    ref = jax.nn.softmax(logits, axis=-1)

    assert out.shape == (batch, output_dim)
    # Tolerance covers MXU-vs-XLA accumulation order differences.
    assert jnp.allclose(out, ref, atol=2e-3, rtol=2e-3)
    # Exact normalization in-kernel -> rows sum to 1 to f32 precision.
    assert jnp.allclose(jnp.sum(out, axis=-1), 1.0, atol=1e-3)

    print("KERNEL_OK")
</pallas_src>

<mosaic_0001>
module attributes {stable_mosaic.version = 11 : i64} {
  func.func @policy_kernel(%arg0: i32, %arg1: memref<16x32xf32, #tpu.memory_space<vmem>>, %arg2: memref<32x128xbf16, #tpu.memory_space<vmem>>, %arg3: memref<1x128xf32, #tpu.memory_space<vmem>>, %arg4: memref<128x128xbf16, #tpu.memory_space<vmem>>, %arg5: memref<1x128xf32, #tpu.memory_space<vmem>>, %arg6: memref<128x128xbf16, #tpu.memory_space<vmem>>, %arg7: memref<1x128xf32, #tpu.memory_space<vmem>>, %arg8: memref<16x4xf32, #tpu.memory_space<vmem>>) attributes {dimension_semantics = [#tpu.dimension_semantics<parallel>], iteration_bounds = array<i64: 1>, scalar_prefetch = 0 : i64, scratch_operands = 0 : i64, tpu.core_type = #tpu.core_type<tc>, window_params = [{transform_indices = @transform_0, window_bounds = array<i64: 16, 32>}, {pipeline_mode = #tpu.pipeline_mode<synchronous>, transform_indices = @transform_1, window_bounds = array<i64: 32, 128>}, {pipeline_mode = #tpu.pipeline_mode<synchronous>, transform_indices = @transform_2, window_bounds = array<i64: 1, 128>}, {pipeline_mode = #tpu.pipeline_mode<synchronous>, transform_indices = @transform_3, window_bounds = array<i64: 128, 128>}, {pipeline_mode = #tpu.pipeline_mode<synchronous>, transform_indices = @transform_4, window_bounds = array<i64: 1, 128>}, {pipeline_mode = #tpu.pipeline_mode<synchronous>, transform_indices = @transform_5, window_bounds = array<i64: 128, 128>}, {pipeline_mode = #tpu.pipeline_mode<synchronous>, transform_indices = @transform_6, window_bounds = array<i64: 1, 128>}, {transform_indices = @transform_7, window_bounds = array<i64: 16, 4>}]} {
    %c0 = arith.constant 0 : index
    %c0_0 = arith.constant 0 : index
    %0 = vector.load %arg1[%c0, %c0_0] : memref<16x32xf32, #tpu.memory_space<vmem>>, vector<16x32xf32>
    %1 = arith.truncf %0 : vector<16x32xf32> to vector<16x32xbf16>
    %c0_1 = arith.constant 0 : index
    %c0_2 = arith.constant 0 : index
    %2 = vector.load %arg2[%c0_1, %c0_2] : memref<32x128xbf16, #tpu.memory_space<vmem>>, vector<32x128xbf16>
    %cst = arith.constant dense<0.000000e+00> : vector<16x128xf32>
    %3 = tpu.matmul %1, %2, %cst {dimension_numbers = #tpu.dot_dimension_numbers<[1], [0], [0], [1], [0, 0, 1, 1], [], []>} : vector<16x32xbf16>, vector<32x128xbf16>, vector<16x128xf32> -> vector<16x128xf32>
    %c0_3 = arith.constant 0 : index
    %c0_4 = arith.constant 0 : index
    %4 = vector.load %arg3[%c0_3, %c0_4] : memref<1x128xf32, #tpu.memory_space<vmem>>, vector<1x128xf32>
    %5 = vector.broadcast %4 : vector<1x128xf32> to vector<16x128xf32>
    %6 = arith.addf %3, %5 : vector<16x128xf32>
    %cst_5 = arith.constant 0.000000e+00 : f32
    %7 = vector.broadcast %cst_5 : f32 to vector<16x128xf32>
    %8 = arith.maximumf %6, %7 : vector<16x128xf32>
    %9 = arith.truncf %8 : vector<16x128xf32> to vector<16x128xbf16>
    %c0_6 = arith.constant 0 : index
    %c0_7 = arith.constant 0 : index
    %10 = vector.load %arg4[%c0_6, %c0_7] : memref<128x128xbf16, #tpu.memory_space<vmem>>, vector<128x128xbf16>
    %cst_8 = arith.constant dense<0.000000e+00> : vector<16x128xf32>
    %11 = tpu.matmul %9, %10, %cst_8 {dimension_numbers = #tpu.dot_dimension_numbers<[1], [0], [0], [1], [0, 0, 1, 1], [], []>} : vector<16x128xbf16>, vector<128x128xbf16>, vector<16x128xf32> -> vector<16x128xf32>
    %c0_9 = arith.constant 0 : index
    %c0_10 = arith.constant 0 : index
    %12 = vector.load %arg5[%c0_9, %c0_10] : memref<1x128xf32, #tpu.memory_space<vmem>>, vector<1x128xf32>
    %13 = vector.broadcast %12 : vector<1x128xf32> to vector<16x128xf32>
    %14 = arith.addf %11, %13 : vector<16x128xf32>
    %cst_11 = arith.constant 0.000000e+00 : f32
    %15 = vector.broadcast %cst_11 : f32 to vector<16x128xf32>
    %16 = arith.maximumf %14, %15 : vector<16x128xf32>
    %17 = arith.truncf %16 : vector<16x128xf32> to vector<16x128xbf16>
    %c0_12 = arith.constant 0 : index
    %c0_13 = arith.constant 0 : index
    %18 = vector.load %arg6[%c0_12, %c0_13] : memref<128x128xbf16, #tpu.memory_space<vmem>>, vector<128x128xbf16>
    %cst_14 = arith.constant dense<0.000000e+00> : vector<16x128xf32>
    %19 = tpu.matmul %17, %18, %cst_14 {dimension_numbers = #tpu.dot_dimension_numbers<[1], [0], [0], [1], [0, 0, 1, 1], [], []>} : vector<16x128xbf16>, vector<128x128xbf16>, vector<16x128xf32> -> vector<16x128xf32>
    %c0_15 = arith.constant 0 : index
    %c0_16 = arith.constant 0 : index
    %20 = vector.load %arg7[%c0_15, %c0_16] : memref<1x128xf32, #tpu.memory_space<vmem>>, vector<1x128xf32>
    %21 = vector.broadcast %20 : vector<1x128xf32> to vector<16x128xf32>
    %22 = arith.addf %19, %21 : vector<16x128xf32>
    %cst_17 = arith.constant dense<0xFF800000> : vector<16xf32>
    %23 = vector.multi_reduction <maximumf>, %22, %cst_17 [1] : vector<16x128xf32> to vector<16xf32>
    %24 = vector.shape_cast %23 : vector<16xf32> to vector<16x1xf32>
    %25 = vector.broadcast %24 : vector<16x1xf32> to vector<16x128xf32>
    %26 = arith.subf %22, %25 : vector<16x128xf32>
    %27 = math.exp %26 : vector<16x128xf32>
    %cst_18 = arith.constant dense<0.000000e+00> : vector<16xf32>
    %28 = vector.multi_reduction <add>, %27, %cst_18 [1] : vector<16x128xf32> to vector<16xf32>
    %29 = vector.shape_cast %28 : vector<16xf32> to vector<16x1xf32>
    %30 = vector.broadcast %29 : vector<16x1xf32> to vector<16x128xf32>
    %31 = arith.divf %27, %30 : vector<16x128xf32>
    %32 = vector.extract_strided_slice %31 {offsets = [0, 0], sizes = [16, 4], strides = [1, 1]} : vector<16x128xf32> to vector<16x4xf32>
    %c0_19 = arith.constant 0 : index
    %c0_20 = arith.constant 0 : index
    %33 = vector.load %arg8[%c0_19, %c0_20] : memref<16x4xf32, #tpu.memory_space<vmem>>, vector<16x4xf32>
    tpu.vector_store %arg8[%c0_19, %c0_20], %32 {strides = array<i32>} : memref<16x4xf32, #tpu.memory_space<vmem>>, vector<16x4xf32>,
    return
  }
  func.func @transform_0(%arg0: i32) -> (i32, i32) {
    %c0_i32 = arith.constant 0 : i32
    %c0_i32_0 = arith.constant 0 : i32
    return %arg0, %c0_i32 : i32, i32
  }
  func.func @transform_1(%arg0: i32) -> (i32, i32) {
    %c0_i32 = arith.constant 0 : i32
    %c0_i32_0 = arith.constant 0 : i32
    %c0_i32_1 = arith.constant 0 : i32
    return %c0_i32, %c0_i32_0 : i32, i32
  }
  func.func @transform_2(%arg0: i32) -> (i32, i32) {
    %c0_i32 = arith.constant 0 : i32
    %c0_i32_0 = arith.constant 0 : i32
    %c0_i32_1 = arith.constant 0 : i32
    return %c0_i32, %c0_i32_0 : i32, i32
  }
  func.func @transform_3(%arg0: i32) -> (i32, i32) {
    %c0_i32 = arith.constant 0 : i32
    %c0_i32_0 = arith.constant 0 : i32
    %c0_i32_1 = arith.constant 0 : i32
    return %c0_i32, %c0_i32_0 : i32, i32
  }
  func.func @transform_4(%arg0: i32) -> (i32, i32) {
    %c0_i32 = arith.constant 0 : i32
    %c0_i32_0 = arith.constant 0 : i32
    %c0_i32_1 = arith.constant 0 : i32
    return %c0_i32, %c0_i32_0 : i32, i32
  }
  func.func @transform_5(%arg0: i32) -> (i32, i32) {
    %c0_i32 = arith.constant 0 : i32
    %c0_i32_0 = arith.constant 0 : i32
    %c0_i32_1 = arith.constant 0 : i32
    return %c0_i32, %c0_i32_0 : i32, i32
  }
  func.func @transform_6(%arg0: i32) -> (i32, i32) {
    %c0_i32 = arith.constant 0 : i32
    %c0_i32_0 = arith.constant 0 : i32
    %c0_i32_1 = arith.constant 0 : i32
    return %c0_i32, %c0_i32_0 : i32, i32
  }
  func.func @transform_7(%arg0: i32) -> (i32, i32) {
    %c0_i32 = arith.constant 0 : i32
    %c0_i32_0 = arith.constant 0 : i32
    return %arg0, %c0_i32 : i32, i32
  }
}

</mosaic_0001>

<bundles_post_ra>
// kernel: tpu_custom_call.1
= control target key start
LH: loop header
LB: loop body
LE: loop exit
PB: predicated region body
PF: predicated region fallthrough
CT: control target
= control target key end

     0   :  { %12 = vsyncpa [#allocation3], 0  ;;  %s785_s0 = inlined_call_operand.hbm [shape: f32[16,32], index: 0, kind: input, shape index: {}]   ;;  %s786_s1 = inlined_call_operand.hbm [shape: bf16[32,128], index: 1, kind: input, shape index: {}]   ;;  %s787_s2 = inlined_call_operand.vmem [shape: f32[1,128], index: 2, kind: input, shape index: {}]   ;;  %s788_s3 = inlined_call_operand.hbm [shape: bf16[128,128], index: 3, kind: input, shape index: {}]   ;;  %s789_s4 = inlined_call_operand.vmem [shape: f32[1,128], index: 4, kind: input, shape index: {}]   ;;  %s790_s5 = inlined_call_operand.hbm [shape: bf16[128,128], index: 5, kind: input, shape index: {}]   ;;  %s791_s6 = inlined_call_operand.vmem [shape: f32[1,128], index: 6, kind: input, shape index: {}]   ;;  %s792_s7 = inlined_call_operand.vmem [shape: f32[16,4], index: 7, kind: output, shape index: {}]  }
   0x1   :  { %13 = vsyncpa [#allocation5], 0 }
   0x2   :  { %14 = vsyncpa [#allocation8], 0  ;;  %s632_s24 = smov [#allocation4]   ;;  %s538_s28 = scalar_lea.hbm %s786_s1, 256 }
   0x3   :  { %s32_s25 = sshll.u32 %s632_s24, 4  ;;  %p539_p0 = scmp.ne.s32.totalorder %s786_s1, %s538_s28  ;;  %s33_s25 = int_to_ptr.vmem [resolvable:$true] %s32_s25 }
   0x4   :  { %p542_p1 = scmp.lt.u32.totalorder %s538_s28, %s786_s1 }
   0x6   :  { %p544_p2 = pnand %p542_p1, %p539_p0 }
   0x8   :  { %547 = shalt.err (!%p544_p2)
}
   0x9   :  { %s548_s10 = scalar_lea.vmem %s33_s25, 256  ;;  %p553_p4 = scmp.lt.s32.totalorder %s33_s25, %s33_s25 }
   0xa   :  { %p549_p3 = scmp.ne.s32.totalorder %s33_s25, %s548_s10  ;;  %p554_p5 = scmp.lt.s32.totalorder %s548_s10, %s548_s10 }
   0xc   :  { %p555_p6 = por %p554_p5, %p553_p4 }
   0xe   :  { %p556_p7 = pnand %p555_p6, %p549_p3 }
  0x10   :  { %559 = shalt.err (!%p556_p7)
}
  0x11   :  { %s633_s11 = smov 64   ;;  %s634_s12 = smov 4  }
  0x12   :  { %38 = dma.hbm_to_vmem [thread:$0]  %s786_s1, 256, %s33_s25, [#allocation5], %s633_s11, %s633_s11, %s634_s12  }
  0x13   :  { %s635_s15 = smov [#allocation2]   ;;  %s560_s19 = scalar_lea.hbm %s785_s0, 256 }
  0x14   :  { %s20_s16 = sshll.u32 %s635_s15, 4  ;;  %p561_p8 = scmp.ne.s32.totalorder %s785_s0, %s560_s19  ;;  %s21_s16 = int_to_ptr.vmem [resolvable:$true] %s20_s16 }
  0x15   :  { %p564_p9 = scmp.lt.u32.totalorder %s560_s19, %s785_s0 }
  0x17   :  { %p566_p10 = pnand %p564_p9, %p561_p8 }
  0x19   :  { %569 = shalt.err (!%p566_p10)
}
  0x1a   :  { %s570_s24 = scalar_lea.vmem %s21_s16, 256  ;;  %p575_p12 = scmp.lt.s32.totalorder %s21_s16, %s21_s16 }
  0x1b   :  { %p571_p11 = scmp.ne.s32.totalorder %s21_s16, %s570_s24  ;;  %p576_p13 = scmp.lt.s32.totalorder %s570_s24, %s570_s24 }
  0x1d   :  { %p577_p0 = por %p576_p13, %p575_p12 }
  0x1f   :  { %p578_p1 = pnand %p577_p0, %p571_p11 }
  0x21   :  { %581 = shalt.err (!%p578_p1)
}
  0x22   :  { %s636_s1 = smov 128   ;;  %s637_s25 = smov 8  }
  0x23   :  { %26 = dma.hbm_to_vmem [thread:$0]  %s785_s0, 256, %s21_s16, [#allocation3], %s636_s1, %s636_s1, %s637_s25  }
  0x24   :  { %s638_s28 = smov [#allocation6]   ;;  %s639_s30 = smov [#allocation7]  }
  0x25   :  { %s46_s29 = sshll.u32 %s638_s28, 4  ;;  %s60_s8 = sshll.u32 %s639_s30, 4  ;;  %s47_s29 = int_to_ptr.vmem [resolvable:$true] %s46_s29  ;;  %s709_s8 = int_to_ptr.vmem [resolvable:$true] %s60_s8 }
  0x26   :  { %s582_s13 = scalar_lea.hbm %s788_s3, 1024 }
  0x27   :  { %p583_p2 = scmp.ne.s32.totalorder %s788_s3, %s582_s13  ;;  %p586_p3 = scmp.lt.u32.totalorder %s582_s13, %s788_s3 }
  0x29   :  { %p588_p4 = pnand %p586_p3, %p583_p2 }
  0x2b   :  { %591 = shalt.err (!%p588_p4)
}
  0x2c   :  { %s592_s0 = scalar_lea.vmem %s47_s29, 1024  ;;  %p597_p6 = scmp.lt.s32.totalorder %s47_s29, %s47_s29 }
  0x2d   :  { %p593_p5 = scmp.ne.s32.totalorder %s47_s29, %s592_s0  ;;  %p598_p7 = scmp.lt.s32.totalorder %s592_s0, %s592_s0 }
  0x2f   :  { %p599_p8 = por %p598_p7, %p597_p6 }
  0x31   :  { %p600_p9 = pnand %p599_p8, %p593_p5 }
  0x33   :  { %603 = shalt.err (!%p600_p9)
}
  0x34   :  { %52 = dma.hbm_to_vmem [thread:$0]  %s788_s3, 1024, %s47_s29, [#allocation5], %s633_s11, %s633_s11, %s634_s12  }
  0x35   :  { %s604_s22 = scalar_lea.hbm %s790_s5, 1024 }
  0x36   :  { %p605_p10 = scmp.ne.s32.totalorder %s790_s5, %s604_s22  ;;  %p608_p11 = scmp.lt.u32.totalorder %s604_s22, %s790_s5 }
  0x38   :  { %p610_p12 = pnand %p608_p11, %p605_p10 }
  0x3a   :  { %613 = shalt.err (!%p610_p12)
}
  0x3b   :  { %s614_s26 = scalar_lea.vmem %s709_s8, 1024  ;;  %p619_p0 = scmp.lt.s32.totalorder %s709_s8, %s709_s8 }
  0x3c   :  { %p615_p13 = scmp.ne.s32.totalorder %s709_s8, %s614_s26  ;;  %p620_p1 = scmp.lt.s32.totalorder %s614_s26, %s614_s26 }
  0x3e   :  { %p621_p2 = por %p620_p1, %p619_p0 }
  0x40   :  { %p622_p3 = pnand %p621_p2, %p615_p13 }
  0x42   :  { %625 = shalt.err (!%p622_p3)
}
  0x43   :  { %66 = dma.hbm_to_vmem [thread:$0]  %s790_s5, 1024, %s709_s8, [#allocation8], %s633_s11, %s633_s11, %s634_s12  }
  0x44   :  { %626 = dma.done.wait [#allocation3], 256  }
  0x45   :  { %627 = vsyncadd [#allocation3], 4294967040 }
  0x46   :  { %628 = dma.done.wait [#allocation5], 1280  }
  0x47   :  { %629 = vsyncadd [#allocation5], 4294966016 }
  0x48   :  { %630 = dma.done.wait [#allocation8], 1024  }
  0x49   :  { %631 = vsyncadd [#allocation8], 4294966272  ;;  %v640_v0 = vmov 0.0   ;;  %vm641_vm0 = vmmov 0   ;;  %v512_v1 = vld [vmem:[#allocation4] sm:$0xff]   ;;  %v513_v2 = vld [vmem:[#allocation4 + $0x8] sm:$0xff]  }
  0x4a   :  { %454 = vmatprep.subr.bf16.mxu0 %v640_v0  ;;  %458 = vmatprep.mubr.msk.bf16.mxu0 %vm641_vm0, %v640_v0  ;;  %v82_v3 = vld [vmem:[#allocation2] sm:$0xff]  ;;  %v83_v4 = vld [vmem:[#allocation2 + $0x8] sm:$0xff]  ;;  %vm108_vm1 = vcmask 261120   ;;  %v516_v8 = vld [vmem:[#allocation6 + $0x10] sm:$0xff]   ;;  %vm401_vm2 = vcmask 31744  }
  0x4b   :  { %462 = vmatprep.subr.bf16.mxu1 %v640_v0  ;;  %478 = vmatprep.mubr.msk.bf16.mxu1 %vm641_vm0, %v640_v0  ;;  %v514_v5 = vld [vmem:[#allocation6] sm:$0xff]   ;;  %v84_v6 = vpack.c.bf16 %v83_v4, %v82_v3  ;;  %v515_v7 = vld [vmem:[#allocation6 + $0x8] sm:$0xff]   ;;  %v517_v9 = vld [vmem:[#allocation6 + $0x18] sm:$0xff]  }
  0x4c   :  { %455 = vmatpush3.bf16.msra.mxu0 %v512_v1  ;;  %463 = vmatpush3.bf16.msra.mxu1 %v514_v5  ;;  %v518_v10 = vld [vmem:[#allocation6 + $0x20] sm:$0xff]   ;;  %v519_v11 = vld [vmem:[#allocation6 + $0x28] sm:$0xff]   ;;  %v520_v12 = vld [vmem:[#allocation6 + $0x30] sm:$0xff]  }
  0x4d   :  { %456 = vmatprep.subr.bf16.mxu0 %v640_v0  ;;  %464 = vmatprep.subr.bf16.mxu1 %v640_v0  ;;  %v521_v13 = vld [vmem:[#allocation6 + $0x38] sm:$0xff]   ;;  %v522_v14 = vld [vmem:[#allocation7] sm:$0xff]   ;;  %v523_v15 = vld [vmem:[#allocation7 + $0x8] sm:$0xff]  }
  0x4e   :  { %v524_v16 = vld [vmem:[#allocation7 + $0x10] sm:$0xff]   ;;  %v525_v17 = vld [vmem:[#allocation7 + $0x18] sm:$0xff]   ;;  %v526_v18 = vld [vmem:[#allocation7 + $0x20] sm:$0xff]  }
  0x4f   :  { %v527_v19 = vld [vmem:[#allocation7 + $0x28] sm:$0xff]   ;;  %v411_v20 = vld [vmem:[%s787_s2] ss:$0 sm:$0xff]  ;;  %v528_v30 = vld [vmem:[#allocation7 + $0x30] sm:$0xff]  }
  0x50   :  { %457 = vmatpush3.bf16.msra.mxu0 %v513_v2  ;;  %465 = vmatpush3.bf16.msra.mxu1 %v515_v7  ;;  %v529_v31 = vld [vmem:[#allocation7 + $0x38] sm:$0xff]   ;;  %v415_v32 = vld [vmem:[%s789_s4] ss:$0 sm:$0xff] }
  0x51   :  { %482 = vmatprep.subr.bf16.mxu0 %v640_v0  ;;  %466 = vmatprep.subr.bf16.mxu1 %v640_v0  ;;  %v424_v42 = vld [vmem:[%s791_s6] ss:$0 sm:$0xff] }
  0x53   :  { %459 = vmatmul.mubr.msk.bf16.vlgmr.msra.gmra.mrb[0].mxu0 %vm108_vm1, %v84_v6 }
  0x54   :  { %498 = vmatprep.mubr.msk.bf16.mxu0 %vm641_vm0, %v640_v0  ;;  %467 = vmatpush3.bf16.msra.mxu1 %v516_v8 }
  0x55   :  { %468 = vmatprep.subr.bf16.mxu1 %v640_v0  ;;  %483 = vmatpush3.bf16.msra.mxu0 %v522_v14 }
  0x56   :  { %484 = vmatprep.subr.bf16.mxu0 %v640_v0 }
  0x58   :  { %469 = vmatpush3.bf16.msra.mxu1 %v517_v9 }
  0x59   :  { %470 = vmatprep.subr.bf16.mxu1 %v640_v0  ;;  %485 = vmatpush3.bf16.msra.mxu0 %v523_v15 }
  0x5a   :  { %486 = vmatprep.subr.bf16.mxu0 %v640_v0 }
  0x5c   :  { %471 = vmatpush3.bf16.msra.mxu1 %v518_v10 }
  0x5d   :  { %472 = vmatprep.subr.bf16.mxu1 %v640_v0  ;;  %487 = vmatpush3.bf16.msra.mxu0 %v524_v16 }
  0x5e   :  { %488 = vmatprep.subr.bf16.mxu0 %v640_v0 }
  0x60   :  { %473 = vmatpush3.bf16.msra.mxu1 %v519_v11 }
  0x61   :  { %474 = vmatprep.subr.bf16.mxu1 %v640_v0  ;;  %489 = vmatpush3.bf16.msra.mxu0 %v525_v17 }
  0x62   :  { %490 = vmatprep.subr.bf16.mxu0 %v640_v0 }
  0x64   :  { %475 = vmatpush3.bf16.msra.mxu1 %v520_v12 }
  0x65   :  { %476 = vmatprep.subr.bf16.mxu1 %v640_v0  ;;  %491 = vmatpush3.bf16.msra.mxu0 %v526_v18 }
  0x66   :  { %492 = vmatprep.subr.bf16.mxu0 %v640_v0 }
  0x68   :  { %477 = vmatpush3.bf16.msra.mxu1 %v521_v13 }
  0x69   :  { %493 = vmatpush3.bf16.msra.mxu0 %v527_v19 }
  0x6a   :  { %494 = vmatprep.subr.bf16.mxu0 %v640_v0 }
  0x6d   :  { %495 = vmatpush3.bf16.msra.mxu0 %v528_v30 }
  0x6e   :  { %496 = vmatprep.subr.bf16.mxu0 %v640_v0 }
  0x71   :  { %497 = vmatpush3.bf16.msra.mxu0 %v529_v31 }
 0x126   :  { %v146_v21 = vpop.f32.mrb[0].mxu0 }
 0x127   :  { %v147_v22 = vadd.f32 %v411_v20, %v146_v21  ;;  %v460_v23 = vpop.f32.mrb[1].mxu0 }
 0x128   :  { %v149_v24 = vpop.f32.mrb[2].mxu0 }
 0x129   :  { %v150_v25 = vadd.f32 %v411_v20, %v149_v24  ;;  %v461_v26 = vpop.f32.mrb[3].mxu0  ;;  %v153_v27 = vmax.f32 %v147_v22, 0.0 }
 0x12b   :  { %v154_v28 = vmax.f32 %v150_v25, 0.0 }
 0x12d   :  { %v155_v29 = vpack.c.bf16 %v154_v28, %v153_v27 }
 0x12f   :  { %479 = vmatmul.mubr.bf16.vlgmr.msra.gmra.mrb[0].mxu1 %v155_v29 }
 0x202   :  { %v261_v33 = vpop.f32.mrb[0].mxu1 }
 0x203   :  { %v262_v34 = vadd.f32 %v415_v32, %v261_v33  ;;  %v480_v35 = vpop.f32.mrb[1].mxu1 }
 0x204   :  { %v264_v36 = vpop.f32.mrb[2].mxu1 }
 0x205   :  { %v265_v37 = vadd.f32 %v415_v32, %v264_v36  ;;  %v481_v38 = vpop.f32.mrb[3].mxu1  ;;  %v268_v39 = vmax.f32 %v262_v34, 0.0 }
 0x207   :  { %v269_v40 = vmax.f32 %v265_v37, 0.0 }
 0x209   :  { %v270_v41 = vpack.c.bf16 %v269_v40, %v268_v39 }
 0x20b   :  { %499 = vmatmul.mubr.bf16.vlgmr.msra.gmra.mrb[4].mxu0 %v270_v41 }
 0x2de   :  { %v376_v43 = vpop.f32.mrb[4].mxu0 }
 0x2df   :  { %v377_v44 = vadd.f32 %v424_v42, %v376_v43  ;;  %v500_v45 = vpop.f32.mrb[5].mxu0 }
 0x2e0   :  { %v379_v46 = vpop.f32.mrb[6].mxu0 }
 0x2e1   :  { %383 = vmax.xlane.f32.xlu0 %v377_v44  ;;  %v501_v47 = vpop.f32.mrb[7].mxu0  ;;  %v380_v48 = vadd.f32 %v424_v42, %v379_v46 }
 0x2e5   :  { %385 = vmax.xlane.f32.xlu0 %v380_v48 }
 0x36e   :  { %v384_v49 = vpop.xlane.xlu0 %383 }
 0x36f   :  { %v387_v50 = vsub.f32 %v377_v44, %v384_v49 }
 0x371   :  { %v389_v51 = vmul.f32 1.442695, %v387_v50 }
 0x372   :  { %v386_v52 = vpop.xlane.xlu0 %385 }
 0x373   :  { %530 = vpow2.f32 %v389_v51  ;;  %v388_v53 = vsub.f32 %v380_v48, %v386_v52 }
 0x375   :  { %v391_v54 = vmul.f32 1.442695, %v388_v53 }
 0x377   :  { %532 = vpow2.f32 %v391_v54 }
 0x37d   :  { %v531_v55 = vpop.eup %530 }
 0x37e   :  { %393 = vadd.xlane.f32.xlu1 %v531_v55 }
 0x381   :  { %v533_v56 = vpop.eup %532 }
 0x382   :  { %395 = vadd.xlane.f32.xlu1 %v533_v56 }
 0x40b   :  { %v394_v57 = vpop.xlane.xlu1 %393 }
 0x40c   :  { %534 = vrcp.f32 %v394_v57 }
 0x40f   :  { %v396_v58 = vpop.xlane.xlu1 %395 }
 0x410   :  { %536 = vrcp.f32 %v396_v58 }
 0x416   :  { %v535_v59 = vpop.eup %534 }
 0x417   :  { %v398_v60 = vmul.f32 %v535_v59, %v531_v55 }
 0x419   :  { %402 = vst.msk [vmem:[%s792_s7] sm:$0xff] %vm401_vm2, %v398_v60 }
 0x41a   :  { %v537_v61 = vpop.eup %536 }
 0x41b   :  { %v400_v62 = vmul.f32 %v537_v61, %v533_v56 }
 0x41d   :  { %403 = vst.msk [vmem:[%s792_s7 + $0x8] sm:$0xff] %vm401_vm2, %v400_v62 }
 0x41e   :  { %408 = vsyncpa [#allocation3], 1 }
 0x41f   :  { %409 = vsyncpa [#allocation5], 1 }
 0x420   :  { %410 = vsyncpa [#allocation8], 1 }

</bundles_post_ra>
